<compile_context>
chip_gen: v5e
topology: v5e:2x2
jax: 0.10.0
libtpu: 0.0.40
codegen_flags: <defaults>
</compile_context>

<pallas_src>
import functools

import jax
import jax.numpy as jnp
from jax.experimental import pallas as pl
from jax.experimental.pallas import tpu as pltpu


def _basic_block_kernel(x_ref, m1_ref, m2_ref, s1_ref, b1_ref, s2_ref, b2_ref,
                        o_ref, *, H, W, Cin, Cout, nB, neg_slope):
    """One grid step processes nB images.

    x_ref  : (nB, H, W*Cin)        f32   input, lane-dense row layout
    m1_ref : (3, W*Cin,  W*Cout)   bf16  conv1 banded (row-Toeplitz) weights
    m2_ref : (3, W*Cout, W*Cout)   bf16  conv2 banded weights
    s*/b*  : (1, W*Cout)           f32   folded BN scale / bias (tiled per col)
    o_ref  : (nB, H, W*Cout)       f32
    """
    WC_in = W * Cin
    WC_out = W * Cout
    bh = nB * H

    x = x_ref[...]                                   # (nB, H, W*Cin) f32
    x_flat = x.reshape(bh, WC_in)                    # collapse leading dims (free)
    x_bf = x_flat.astype(jnp.bfloat16)               # single cast, reused 3x

    # Per-image boundary-row masks for the rolled (shifted) tap results.
    row = jax.lax.broadcasted_iota(jnp.int32, (bh, WC_out), 0) % H
    not_top = row != 0          # rows where the +1-shifted (dh=0) tap is valid
    not_bot = row != (H - 1)    # rows where the -1-shifted (dh=2) tap is valid

    def conv3x3_rows(lhs_bf, m_ref):
        # Three banded matmuls on UNshifted rows (K = N = W*C); the +-1 row
        # shift is applied to the f32 results on the XLU (roll) + mask, so no
        # padded scratch copies or misaligned slices are needed.
        p0 = jnp.dot(lhs_bf, m_ref[0], preferred_element_type=jnp.float32)
        acc = jnp.dot(lhs_bf, m_ref[1], preferred_element_type=jnp.float32)
        p2 = jnp.dot(lhs_bf, m_ref[2], preferred_element_type=jnp.float32)
        # result[h] needs p0[h-1]  -> roll by +1, zero rows with h == 0
        acc = acc + jnp.where(not_top, pltpu.roll(p0, 1, 0), 0.0)
        # result[h] needs p2[h+1]  -> roll by -1 (== bh-1), zero rows h == H-1
        acc = acc + jnp.where(not_bot, pltpu.roll(p2, bh - 1, 0), 0.0)
        return acc

    # ---- conv1 -> bn1 (eval, folded) -> LeakyReLU ----
    out1 = conv3x3_rows(x_bf, m1_ref) * s1_ref[...] + b1_ref[...]
    out1 = jnp.where(out1 > 0, out1, neg_slope * out1)

    # ---- conv2 -> bn2 -> residual add (exact f32 identity) -> LeakyReLU ----
    out2 = conv3x3_rows(out1.astype(jnp.bfloat16), m2_ref) * s2_ref[...] + b2_ref[...]
    out2 = out2 + x_flat                             # Cin == Cout identity path
    out2 = jnp.where(out2 > 0, out2, neg_slope * out2)

    o_ref[...] = out2.reshape(nB, H, WC_out).astype(o_ref.dtype)


def _row_toeplitz(w_oihw, W):
    """PyTorch (Cout, Cin, 3, 3) conv weight -> (3, W*Cin, W*Cout) banded matrices.

    M[dh, wi*Cin + ci, wo*Cout + co] = w[co, ci, dh, wi - wo + 1] for tap index
    in [0, 2], so for row-flattened rows (length W*C):
        conv_out_row[h] = sum_dh x_row[h + dh - 1] @ M[dh]      (x_row[-1]=x_row[H]=0)
    which is the 3x3 conv with stride 1, pad 1 (missing taps == zero padding).
    """
    Cout, Cin, KH, KW = w_oihw.shape
    assert KH == 3 and KW == 3
    taps = jnp.transpose(w_oihw, (2, 3, 1, 0)).astype(jnp.float32)  # (3,3,Cin,Cout)
    wi = jnp.arange(W)[:, None]
    wo = jnp.arange(W)[None, :]
    dw = wi - wo + 1                                   # (W, W) tap index
    valid = (dw >= 0) & (dw <= 2)
    g = taps[:, jnp.clip(dw, 0, 2), :, :]              # (3, W, W, Cin, Cout)
    g = jnp.where(valid[None, :, :, None, None], g, 0.0)
    return jnp.transpose(g, (0, 1, 3, 2, 4)).reshape(3, W * Cin, W * Cout)


def basic_block_forward(x_nchw, w1, w2, bn1, bn2, *, neg_slope=0.01, eps=1e-5):
    """x_nchw: (N, C, H, W) f32; w1: (Cout, Cin, 3, 3); w2: (Cout, Cout, 3, 3).
    bn1/bn2: dicts of gamma, beta, running_mean, running_var, each shape (Cout,)."""
    N, Cin, H, W = x_nchw.shape
    Cout = w1.shape[0]
    assert Cin == Cout, "residual path requires inplanes == planes (stride=1, no resample)"
    assert w2.shape == (Cout, Cout, 3, 3)

    # Images per grid step: keep grid length >= 2 (v7x has 2 TensorCores and the
    # pipeline needs >= 2 steps to overlap DMA), while growing the matmul M
    # dimension (= nB*H rows) toward ~256 to better fill the 256x256 MXU.
    nB = 1
    for cand in range(1, N + 1):
        if N % cand:
            continue
        if cand * H > 256:                 # vreg pressure: keep accumulators small
            continue
        if N > 1 and N // cand < 2:        # keep at least 2 grid steps
            continue
        nB = cand

    WC_in, WC_out = W * Cin, W * Cout

    # NCHW -> lane-dense row layout (N, H, W*C); no spatial padding anywhere.
    x_rows = jnp.transpose(x_nchw, (0, 2, 3, 1)).reshape(N, H, WC_in).astype(jnp.float32)

    # Conv weights -> banded row-matmul form; bf16 operands for the MXU.
    m1 = _row_toeplitz(w1, W).astype(jnp.bfloat16)     # (3, W*Cin,  W*Cout)
    m2 = _row_toeplitz(w2, W).astype(jnp.bfloat16)     # (3, W*Cout, W*Cout)

    def fold(bn):
        scale = bn["gamma"] / jnp.sqrt(bn["running_var"] + eps)
        bias = bn["beta"] - bn["running_mean"] * scale
        s = jnp.tile(scale, W).reshape(1, WC_out).astype(jnp.float32)
        b = jnp.tile(bias, W).reshape(1, WC_out).astype(jnp.float32)
        return s, b

    s1, b1 = fold(bn1)
    s2, b2 = fold(bn2)

    kernel = functools.partial(_basic_block_kernel, H=H, W=W, Cin=Cin, Cout=Cout,
                               nB=nB, neg_slope=neg_slope)

    out_rows = pl.pallas_call(
        kernel,
        out_shape=jax.ShapeDtypeStruct((N, H, WC_out), jnp.float32),
        grid_spec=pltpu.PrefetchScalarGridSpec(
            num_scalar_prefetch=0,
            grid=(N // nB,),
            in_specs=[
                pl.BlockSpec((nB, H, WC_in), lambda n: (n, 0, 0)),
                pl.BlockSpec((3, WC_in, WC_out), lambda n: (0, 0, 0)),
                pl.BlockSpec((3, WC_out, WC_out), lambda n: (0, 0, 0)),
                pl.BlockSpec((1, WC_out), lambda n: (0, 0)),
                pl.BlockSpec((1, WC_out), lambda n: (0, 0)),
                pl.BlockSpec((1, WC_out), lambda n: (0, 0)),
                pl.BlockSpec((1, WC_out), lambda n: (0, 0)),
            ],
            out_specs=pl.BlockSpec((nB, H, WC_out), lambda n: (n, 0, 0)),
        ),
        compiler_params=pltpu.CompilerParams(
            dimension_semantics=("parallel",),
        ),
    )(x_rows, m1, m2, s1, b1, s2, b2)

    # Row layout -> NCHW to match the PyTorch output convention.
    return jnp.transpose(out_rows.reshape(N, H, W, Cout), (0, 3, 1, 2))


def _reference_forward(x_nchw, w1, w2, bn1, bn2, *, neg_slope=0.01, eps=1e-5):
    """Pure-JAX f32 reference (lax conv) for correctness checking."""
    def conv(x, w):
        return jax.lax.conv_general_dilated(
            x, w, window_strides=(1, 1), padding=((1, 1), (1, 1)),
            dimension_numbers=("NCHW", "OIHW", "NCHW"))

    def bn(x, p):
        scale = (p["gamma"] / jnp.sqrt(p["running_var"] + eps)).reshape(1, -1, 1, 1)
        bias = (p["beta"] - p["running_mean"] * p["gamma"]
                / jnp.sqrt(p["running_var"] + eps)).reshape(1, -1, 1, 1)
        return x * scale + bias

    lrelu = lambda v: jnp.where(v > 0, v, neg_slope * v)
    out = lrelu(bn(conv(x_nchw, w1), bn1))
    out = bn(conv(out, w2), bn2)
    out = out + x_nchw
    return lrelu(out)


if __name__ == "__main__":
    key = jax.random.PRNGKey(0)
    N, C, H, W = 2, 8, 16, 16   # inplanes == planes == 8, stride=1, no resample
    k0, k1, k2, k3, k4, k5, k6, k7, k8 = jax.random.split(key, 9)

    x = jax.random.normal(k0, (N, C, H, W), dtype=jnp.float32)
    w1 = jax.random.normal(k1, (C, C, 3, 3), dtype=jnp.float32) * 0.1
    w2 = jax.random.normal(k2, (C, C, 3, 3), dtype=jnp.float32) * 0.1
    bn1 = dict(gamma=1.0 + 0.1 * jax.random.normal(k3, (C,), dtype=jnp.float32),
               beta=0.1 * jax.random.normal(k4, (C,), dtype=jnp.float32),
               running_mean=0.05 * jax.random.normal(k5, (C,), dtype=jnp.float32),
               running_var=jnp.abs(1.0 + 0.1 * jax.random.normal(k6, (C,), dtype=jnp.float32)))
    bn2 = dict(gamma=1.0 + 0.1 * jax.random.normal(k7, (C,), dtype=jnp.float32),
               beta=0.1 * jax.random.normal(k8, (C,), dtype=jnp.float32),
               running_mean=jnp.zeros((C,), jnp.float32),
               running_var=jnp.ones((C,), jnp.float32))

    out = basic_block_forward(x, w1, w2, bn1, bn2)
    out = jax.block_until_ready(out)

    ref = _reference_forward(x, w1, w2, bn1, bn2)
    assert out.shape == (N, C, H, W)
    # bf16 matmul operands (f32 accumulation) -> loosened tolerance vs f32 reference.
    assert jnp.allclose(out, ref, atol=5e-2, rtol=5e-2), "mismatch vs reference"
    print("KERNEL_OK")
</pallas_src>

<mosaic_0001>
module attributes {stable_mosaic.version = 11 : i64} {
  func.func @_basic_block_kernel(%arg0: i32, %arg1: memref<1x16x128xf32, #tpu.memory_space<vmem>>, %arg2: memref<3x128x128xbf16, #tpu.memory_space<vmem>>, %arg3: memref<3x128x128xbf16, #tpu.memory_space<vmem>>, %arg4: memref<1x128xf32, #tpu.memory_space<vmem>>, %arg5: memref<1x128xf32, #tpu.memory_space<vmem>>, %arg6: memref<1x128xf32, #tpu.memory_space<vmem>>, %arg7: memref<1x128xf32, #tpu.memory_space<vmem>>, %arg8: memref<1x16x128xf32, #tpu.memory_space<vmem>>) attributes {dimension_semantics = [#tpu.dimension_semantics<parallel>], iteration_bounds = array<i64: 2>, scalar_prefetch = 0 : i64, scratch_operands = 0 : i64, tpu.core_type = #tpu.core_type<tc>, window_params = [{transform_indices = @transform_0, window_bounds = array<i64: 1, 16, 128>}, {pipeline_mode = #tpu.pipeline_mode<synchronous>, transform_indices = @transform_1, window_bounds = array<i64: 3, 128, 128>}, {pipeline_mode = #tpu.pipeline_mode<synchronous>, transform_indices = @transform_2, window_bounds = array<i64: 3, 128, 128>}, {pipeline_mode = #tpu.pipeline_mode<synchronous>, transform_indices = @transform_3, window_bounds = array<i64: 1, 128>}, {pipeline_mode = #tpu.pipeline_mode<synchronous>, transform_indices = @transform_4, window_bounds = array<i64: 1, 128>}, {pipeline_mode = #tpu.pipeline_mode<synchronous>, transform_indices = @transform_5, window_bounds = array<i64: 1, 128>}, {pipeline_mode = #tpu.pipeline_mode<synchronous>, transform_indices = @transform_6, window_bounds = array<i64: 1, 128>}, {transform_indices = @transform_7, window_bounds = array<i64: 1, 16, 128>}]} {
    %c0 = arith.constant 0 : index
    %c0_0 = arith.constant 0 : index
    %c0_1 = arith.constant 0 : index
    %0 = vector.load %arg1[%c0, %c0_0, %c0_1] : memref<1x16x128xf32, #tpu.memory_space<vmem>>, vector<1x16x128xf32>
    %1 = vector.shape_cast %0 : vector<1x16x128xf32> to vector<16x128xf32>
    %2 = arith.truncf %1 : vector<16x128xf32> to vector<16x128xbf16>
    %3 = tpu.iota {dimensions = array<i32: 0>} : vector<16x128xi32>
    %c16_i32 = arith.constant 16 : i32
    %c0_i32 = arith.constant 0 : i32
    %4 = arith.cmpi eq, %c16_i32, %c0_i32 : i32
    %c1_i32 = arith.constant 1 : i32
    %5 = arith.select %4, %c1_i32, %c16_i32 : i32
    %6 = vector.broadcast %5 : i32 to vector<16x128xi32>
    %7 = arith.remsi %3, %6 : vector<16x128xi32>
    %c0_i32_2 = arith.constant 0 : i32
    %8 = vector.broadcast %c0_i32_2 : i32 to vector<16x128xi32>
    %9 = arith.cmpi ne, %7, %8 : vector<16x128xi32>
    %c0_i32_3 = arith.constant 0 : i32
    %10 = vector.broadcast %c0_i32_3 : i32 to vector<16x128xi32>
    %11 = arith.cmpi slt, %7, %10 : vector<16x128xi32>
    %c0_i32_4 = arith.constant 0 : i32
    %12 = arith.cmpi slt, %5, %c0_i32_4 : i32
    %13 = vector.broadcast %12 : i1 to vector<16x128xi1>
    %14 = vector.broadcast %13 : vector<16x128xi1> to vector<16x128xi1>
    %15 = arith.xori %11, %14 : vector<16x128xi1>
    %16 = arith.andi %15, %9 : vector<16x128xi1>
    %17 = vector.broadcast %5 : i32 to vector<16x128xi32>
    %18 = arith.addi %7, %17 : vector<16x128xi32>
    %19 = arith.select %16, %18, %7 : vector<16x128xi1>, vector<16x128xi32>
    %c0_i32_5 = arith.constant 0 : i32
    %20 = vector.broadcast %c0_i32_5 : i32 to vector<16x128xi32>
    %21 = arith.cmpi ne, %19, %20 : vector<16x128xi32>
    %c15_i32 = arith.constant 15 : i32
    %22 = vector.broadcast %c15_i32 : i32 to vector<16x128xi32>
    %23 = arith.cmpi ne, %19, %22 : vector<16x128xi32>
    %c0_6 = arith.constant 0 : index
    %c0_7 = arith.constant 0 : index
    %c0_8 = arith.constant 0 : index
    %24 = vector.load %arg2[%c0_6, %c0_7, %c0_8] : memref<3x128x128xbf16, #tpu.memory_space<vmem>>, vector<1x128x128xbf16>
    %25 = vector.shape_cast %24 : vector<1x128x128xbf16> to vector<128x128xbf16>
    %cst = arith.constant dense<0.000000e+00> : vector<16x128xf32>
    %26 = tpu.matmul %2, %25, %cst {dimension_numbers = #tpu.dot_dimension_numbers<[1], [0], [0], [1], [0, 0, 1, 1], [], []>} : vector<16x128xbf16>, vector<128x128xbf16>, vector<16x128xf32> -> vector<16x128xf32>
    %c1 = arith.constant 1 : index
    %c0_9 = arith.constant 0 : index
    %c0_10 = arith.constant 0 : index
    %27 = vector.load %arg2[%c1, %c0_9, %c0_10] : memref<3x128x128xbf16, #tpu.memory_space<vmem>>, vector<1x128x128xbf16>
    %28 = vector.shape_cast %27 : vector<1x128x128xbf16> to vector<128x128xbf16>
    %cst_11 = arith.constant dense<0.000000e+00> : vector<16x128xf32>
    %29 = tpu.matmul %2, %28, %cst_11 {dimension_numbers = #tpu.dot_dimension_numbers<[1], [0], [0], [1], [0, 0, 1, 1], [], []>} : vector<16x128xbf16>, vector<128x128xbf16>, vector<16x128xf32> -> vector<16x128xf32>
    %c2 = arith.constant 2 : index
    %c0_12 = arith.constant 0 : index
    %c0_13 = arith.constant 0 : index
    %30 = vector.load %arg2[%c2, %c0_12, %c0_13] : memref<3x128x128xbf16, #tpu.memory_space<vmem>>, vector<1x128x128xbf16>
    %31 = vector.shape_cast %30 : vector<1x128x128xbf16> to vector<128x128xbf16>
    %cst_14 = arith.constant dense<0.000000e+00> : vector<16x128xf32>
    %32 = tpu.matmul %2, %31, %cst_14 {dimension_numbers = #tpu.dot_dimension_numbers<[1], [0], [0], [1], [0, 0, 1, 1], [], []>} : vector<16x128xbf16>, vector<128x128xbf16>, vector<16x128xf32> -> vector<16x128xf32>
    %c1_i32_15 = arith.constant 1 : i32
    %33 = tpu.dynamic_rotate %26 by %c1_i32_15 dim 0 : vector<16x128xf32>, i32 -> vector<16x128xf32>
    %cst_16 = arith.constant 0.000000e+00 : f32
    %34 = vector.broadcast %cst_16 : f32 to vector<16x128xf32>
    %35 = arith.select %21, %33, %34 : vector<16x128xi1>, vector<16x128xf32>
    %36 = arith.addf %29, %35 : vector<16x128xf32>
    %c15_i32_17 = arith.constant 15 : i32
    %37 = tpu.dynamic_rotate %32 by %c15_i32_17 dim 0 : vector<16x128xf32>, i32 -> vector<16x128xf32>
    %cst_18 = arith.constant 0.000000e+00 : f32
    %38 = vector.broadcast %cst_18 : f32 to vector<16x128xf32>
    %39 = arith.select %23, %37, %38 : vector<16x128xi1>, vector<16x128xf32>
    %40 = arith.addf %36, %39 : vector<16x128xf32>
    %c0_19 = arith.constant 0 : index
    %c0_20 = arith.constant 0 : index
    %41 = vector.load %arg4[%c0_19, %c0_20] : memref<1x128xf32, #tpu.memory_space<vmem>>, vector<1x128xf32>
    %42 = vector.broadcast %41 : vector<1x128xf32> to vector<16x128xf32>
    %43 = arith.mulf %40, %42 : vector<16x128xf32>
    %c0_21 = arith.constant 0 : index
    %c0_22 = arith.constant 0 : index
    %44 = vector.load %arg5[%c0_21, %c0_22] : memref<1x128xf32, #tpu.memory_space<vmem>>, vector<1x128xf32>
    %45 = vector.broadcast %44 : vector<1x128xf32> to vector<16x128xf32>
    %46 = arith.addf %43, %45 : vector<16x128xf32>
    %cst_23 = arith.constant 0.000000e+00 : f32
    %47 = vector.broadcast %cst_23 : f32 to vector<16x128xf32>
    %48 = arith.cmpf ogt, %46, %47 : vector<16x128xf32>
    %cst_24 = arith.constant 0.00999999977 : f32
    %49 = vector.broadcast %cst_24 : f32 to vector<16x128xf32>
    %50 = arith.mulf %49, %46 : vector<16x128xf32>
    %51 = arith.select %48, %46, %50 : vector<16x128xi1>, vector<16x128xf32>
    %52 = arith.truncf %51 : vector<16x128xf32> to vector<16x128xbf16>
    %c0_25 = arith.constant 0 : index
    %c0_26 = arith.constant 0 : index
    %c0_27 = arith.constant 0 : index
    %53 = vector.load %arg3[%c0_25, %c0_26, %c0_27] : memref<3x128x128xbf16, #tpu.memory_space<vmem>>, vector<1x128x128xbf16>
    %54 = vector.shape_cast %53 : vector<1x128x128xbf16> to vector<128x128xbf16>
    %cst_28 = arith.constant dense<0.000000e+00> : vector<16x128xf32>
    %55 = tpu.matmul %52, %54, %cst_28 {dimension_numbers = #tpu.dot_dimension_numbers<[1], [0], [0], [1], [0, 0, 1, 1], [], []>} : vector<16x128xbf16>, vector<128x128xbf16>, vector<16x128xf32> -> vector<16x128xf32>
    %c1_29 = arith.constant 1 : index
    %c0_30 = arith.constant 0 : index
    %c0_31 = arith.constant 0 : index
    %56 = vector.load %arg3[%c1_29, %c0_30, %c0_31] : memref<3x128x128xbf16, #tpu.memory_space<vmem>>, vector<1x128x128xbf16>
    %57 = vector.shape_cast %56 : vector<1x128x128xbf16> to vector<128x128xbf16>
    %cst_32 = arith.constant dense<0.000000e+00> : vector<16x128xf32>
    %58 = tpu.matmul %52, %57, %cst_32 {dimension_numbers = #tpu.dot_dimension_numbers<[1], [0], [0], [1], [0, 0, 1, 1], [], []>} : vector<16x128xbf16>, vector<128x128xbf16>, vector<16x128xf32> -> vector<16x128xf32>
    %c2_33 = arith.constant 2 : index
    %c0_34 = arith.constant 0 : index
    %c0_35 = arith.constant 0 : index
    %59 = vector.load %arg3[%c2_33, %c0_34, %c0_35] : memref<3x128x128xbf16, #tpu.memory_space<vmem>>, vector<1x128x128xbf16>
    %60 = vector.shape_cast %59 : vector<1x128x128xbf16> to vector<128x128xbf16>
    %cst_36 = arith.constant dense<0.000000e+00> : vector<16x128xf32>
    %61 = tpu.matmul %52, %60, %cst_36 {dimension_numbers = #tpu.dot_dimension_numbers<[1], [0], [0], [1], [0, 0, 1, 1], [], []>} : vector<16x128xbf16>, vector<128x128xbf16>, vector<16x128xf32> -> vector<16x128xf32>
    %c1_i32_37 = arith.constant 1 : i32
    %62 = tpu.dynamic_rotate %55 by %c1_i32_37 dim 0 : vector<16x128xf32>, i32 -> vector<16x128xf32>
    %cst_38 = arith.constant 0.000000e+00 : f32
    %63 = vector.broadcast %cst_38 : f32 to vector<16x128xf32>
    %64 = arith.select %21, %62, %63 : vector<16x128xi1>, vector<16x128xf32>
    %65 = arith.addf %58, %64 : vector<16x128xf32>
    %c15_i32_39 = arith.constant 15 : i32
    %66 = tpu.dynamic_rotate %61 by %c15_i32_39 dim 0 : vector<16x128xf32>, i32 -> vector<16x128xf32>
    %cst_40 = arith.constant 0.000000e+00 : f32
    %67 = vector.broadcast %cst_40 : f32 to vector<16x128xf32>
    %68 = arith.select %23, %66, %67 : vector<16x128xi1>, vector<16x128xf32>
    %69 = arith.addf %65, %68 : vector<16x128xf32>
    %c0_41 = arith.constant 0 : index
    %c0_42 = arith.constant 0 : index
    %70 = vector.load %arg6[%c0_41, %c0_42] : memref<1x128xf32, #tpu.memory_space<vmem>>, vector<1x128xf32>
    %71 = vector.broadcast %70 : vector<1x128xf32> to vector<16x128xf32>
    %72 = arith.mulf %69, %71 : vector<16x128xf32>
    %c0_43 = arith.constant 0 : index
    %c0_44 = arith.constant 0 : index
    %73 = vector.load %arg7[%c0_43, %c0_44] : memref<1x128xf32, #tpu.memory_space<vmem>>, vector<1x128xf32>
    %74 = vector.broadcast %73 : vector<1x128xf32> to vector<16x128xf32>
    %75 = arith.addf %72, %74 : vector<16x128xf32>
    %76 = arith.addf %75, %1 : vector<16x128xf32>
    %cst_45 = arith.constant 0.000000e+00 : f32
    %77 = vector.broadcast %cst_45 : f32 to vector<16x128xf32>
    %78 = arith.cmpf ogt, %76, %77 : vector<16x128xf32>
    %cst_46 = arith.constant 0.00999999977 : f32
    %79 = vector.broadcast %cst_46 : f32 to vector<16x128xf32>
    %80 = arith.mulf %79, %76 : vector<16x128xf32>
    %81 = arith.select %78, %76, %80 : vector<16x128xi1>, vector<16x128xf32>
    %82 = vector.shape_cast %81 : vector<16x128xf32> to vector<1x16x128xf32>
    %c0_47 = arith.constant 0 : index
    %c0_48 = arith.constant 0 : index
    %c0_49 = arith.constant 0 : index
    %83 = vector.load %arg8[%c0_47, %c0_48, %c0_49] : memref<1x16x128xf32, #tpu.memory_space<vmem>>, vector<1x16x128xf32>
    tpu.vector_store %arg8[%c0_47, %c0_48, %c0_49], %82 {strides = array<i32>} : memref<1x16x128xf32, #tpu.memory_space<vmem>>, vector<1x16x128xf32>,
    return
  }
  func.func @transform_0(%arg0: i32) -> (i32, i32, i32) {
    %c0_i32 = arith.constant 0 : i32
    %c0_i32_0 = arith.constant 0 : i32
    %c0_i32_1 = arith.constant 0 : i32
    return %arg0, %c0_i32, %c0_i32_0 : i32, i32, i32
  }
  func.func @transform_1(%arg0: i32) -> (i32, i32, i32) {
    %c0_i32 = arith.constant 0 : i32
    %c0_i32_0 = arith.constant 0 : i32
    %c0_i32_1 = arith.constant 0 : i32
    %c0_i32_2 = arith.constant 0 : i32
    return %c0_i32, %c0_i32_0, %c0_i32_1 : i32, i32, i32
  }
  func.func @transform_2(%arg0: i32) -> (i32, i32, i32) {
    %c0_i32 = arith.constant 0 : i32
    %c0_i32_0 = arith.constant 0 : i32
    %c0_i32_1 = arith.constant 0 : i32
    %c0_i32_2 = arith.constant 0 : i32
    return %c0_i32, %c0_i32_0, %c0_i32_1 : i32, i32, i32
  }
  func.func @transform_3(%arg0: i32) -> (i32, i32) {
    %c0_i32 = arith.constant 0 : i32
    %c0_i32_0 = arith.constant 0 : i32
    %c0_i32_1 = arith.constant 0 : i32
    return %c0_i32, %c0_i32_0 : i32, i32
  }
  func.func @transform_4(%arg0: i32) -> (i32, i32) {
    %c0_i32 = arith.constant 0 : i32
    %c0_i32_0 = arith.constant 0 : i32
    %c0_i32_1 = arith.constant 0 : i32
    return %c0_i32, %c0_i32_0 : i32, i32
  }
  func.func @transform_5(%arg0: i32) -> (i32, i32) {
    %c0_i32 = arith.constant 0 : i32
    %c0_i32_0 = arith.constant 0 : i32
    %c0_i32_1 = arith.constant 0 : i32
    return %c0_i32, %c0_i32_0 : i32, i32
  }
  func.func @transform_6(%arg0: i32) -> (i32, i32) {
    %c0_i32 = arith.constant 0 : i32
    %c0_i32_0 = arith.constant 0 : i32
    %c0_i32_1 = arith.constant 0 : i32
    return %c0_i32, %c0_i32_0 : i32, i32
  }
  func.func @transform_7(%arg0: i32) -> (i32, i32, i32) {
    %c0_i32 = arith.constant 0 : i32
    %c0_i32_0 = arith.constant 0 : i32
    %c0_i32_1 = arith.constant 0 : i32
    return %arg0, %c0_i32, %c0_i32_0 : i32, i32, i32
  }
}

</mosaic_0001>

<bundles_post_ra>
// kernel: tpu_custom_call.1
= control target key start
LH: loop header
LB: loop body
LE: loop exit
PB: predicated region body
PF: predicated region fallthrough
CT: control target
= control target key end

     0   :  { %s1757_s0 = inlined_call_operand.hbm [shape: f32[2,16,128], index: 0, kind: input, shape index: {}]   ;;  %s1758_s1 = inlined_call_operand.hbm [shape: bf16[3,128,128], index: 1, kind: input, shape index: {}]   ;;  %s1759_s2 = inlined_call_operand.hbm [shape: bf16[3,128,128], index: 2, kind: input, shape index: {}]   ;;  %s1760_s3 = inlined_call_operand.vmem [shape: f32[1,128], index: 3, kind: input, shape index: {}]   ;;  %s1761_s4 = inlined_call_operand.vmem [shape: f32[1,128], index: 4, kind: input, shape index: {}]   ;;  %s1762_s5 = inlined_call_operand.vmem [shape: f32[1,128], index: 5, kind: input, shape index: {}]   ;;  %s1763_s6 = inlined_call_operand.vmem [shape: f32[1,128], index: 6, kind: input, shape index: {}]   ;;  %s1764_s7 = inlined_call_operand.hbm [shape: f32[2,16,128], index: 7, kind: output, shape index: {}]  }
   0x1   :  { %1765 = sst [smem:[#allocation12_spill]] %s1758_s1 }
   0x2   :  { %12 = vsyncpa [#allocation3], 0 }
   0x3   :  { %14 = vsyncpa [#allocation3 + $0x1], 0 }
   0x4   :  { %15 = vsyncpa [#allocation6], 0 }
   0x5   :  { %16 = vsyncpa [#allocation4], 0 }
   0x6   :  { %18 = vsyncpa [#allocation4 + $0x1], 0  ;;  %s1564_s24 = smov 0   ;;  %s1566_s25 = smov 0  }
   0x7   :  { %s1568_s26 = smov 0   ;;  %s1570_s27 = smov 0  }
   0x8 LB: > { %s1585_s28 = sadd.s32 4294967295, %s1514_s27   ;;  %s1017_s29 = sadd.s32 4294967294, %s1514_s27   ;;  %s1514_s27 = sphi %s1570_s27, %s1780_s27   ;;  %s1510_s26 = sphi %s1568_s26, %s1779_s26   ;;  %s1506_s25 = sphi %s1566_s25, %s1778_s25   ;;  %s1502_s24 = sphi %s1564_s24, %s1777_s24  }
   0x9   : > { %p44_p0 = scmp.ne.s32.totalorder %s1506_s25, %s1502_s24  ;;  %p45_p1 = scmp.eq.s32.totalorder %s1585_s28, 0 }
   0xa   : > { %p194_p2 = scmp.eq.s32.totalorder %s1585_s28, 1  ;;  %p200_p3 = scmp.eq.s32.totalorder %s1017_s29, 1 }
   0xb   : > { %p1594_p4 = por %p45_p1, %p44_p0  ;;  %p1018_p5 = scmp.ge.s32.totalorder %s1514_s27, 1 }
   0xc   : > { %p1599_p6 = por %p200_p3, %p44_p0  ;;  %p207_p7 = scmp.lt.s32.totalorder %s1514_s27, 3 }
   0xd   : > { %s1768_s1 = sld [smem:[#allocation12_spill]]  ;;  %s1516_s13 = smov [#allocation5]  }
   0xe   : > { %p1607_p8 = pnand %p1018_p5, %p207_p7  ;;  %s220_s14 = sshll.u32 %s1516_s13, 4  ;;  %s221_s14 = int_to_ptr.vmem [resolvable:$true] %s220_s14 }
   0xf   : > { %s232_s17 = sshll.u32 %s1759_s2, 4  ;;  %s1517_s18 = smov 64   ;;  %s233_s17 = int_to_ptr.hbm [resolvable:$true] %s232_s17 }
  0x10   : > { %p1289_p9 = pneg %p1607_p8  ;;  %s1518_s19 = smov 4  }
  0x11   : > { %s1519_s20 = smov [#allocation7]   ;;  %s1620_s22 = sadd.s32 1, %s1514_s27  }
  0x12   : > { %p1290_p10 = pnand %p1289_p9, %p45_p1  ;;  %s234_s21 = sshll.u32 %s1519_s20, 4  ;;  %s235_s21 = int_to_ptr.vmem [resolvable:$true] %s234_s21 }
  0x13   : > { %s218_s11 = sshll.u32 %s1768_s1, 4  ;;  %s31_s23 = sadd.s32 1, %s1510_s26  ;;  %s219_s11 = int_to_ptr.hbm [resolvable:$true] %s218_s11 }
  0x14   : > { %1292 = dma.hbm_to_vmem [thread:$0]  (!%p1290_p10), %s219_s11, 3072, %s221_s14, [#allocation6], %s1517_s18, %s1517_s18, %s1518_s19  }
  0x15   : > { %1295 = dma.hbm_to_vmem [thread:$0]  (!%p1290_p10), %s233_s17, 3072, %s235_s21, [#allocation6], %s1517_s18, %s1517_s18, %s1518_s19  }
  0x16   : > { %s28_s29 = ssub.s32 %s1514_s27, %s1620_s22  ;;  %p38_p12 = scmp.ne.s32.totalorder %s1510_s26, %s1506_s25 }
  0x17   : > { %p29_p13 = scmp.eq.s32.totalorder %s28_s29, 0  ;;  %p39_p0 = scmp.eq.s32.totalorder %s1514_s27, 0 }
  0x18   : > { %p1630_p3 = por %p194_p2, %p38_p12  ;;  %p1306_p5 = scmp.lt.s32.totalorder %s1514_s27, 2 }
  0x19   : > { %s1636_s10 = scalar_select %p29_p13, %s1510_s26, %s31_s23  }
  0x1a   : > { %p40_p7 = por %p39_p0, %p38_p12  ;;  %s260_s11 = sand.u32 1, %s1510_s26  }
  0x1b   : > { %s1022_s13 = sshll.u32 %s260_s11, 4  ;;  %s1227_s14 = sshll.u32 %s1514_s27, 4 }
  0x1c   : > { %s269_s17 = scalar_lea.hbm %s1757_s0, %s1227_s14  ;;  %s264_s18 = scalar_lea.vmem [#allocation2], %s1022_s13 }
  0x1d   : > { %s272_s19 = sshll.u32 %s264_s18, 4  ;;  %s270_s20 = sshll.u32 %s269_s17, 4  ;;  %s273_s19 = int_to_ptr.vmem [resolvable:$true] %s272_s19  ;;  %s271_s20 = int_to_ptr.hbm [resolvable:$true] %s270_s20 }
  0x1e   : > { %p1643_p2 = pnand %p1306_p5, %p40_p7  ;;  %s261_s23 = scalar_lea.sflag [#allocation3], %s260_s11 }
  0x1f   : > { %s1414_s29 = sshra.s32 %s271_s20, 4  ;;  %s1421_s15 = scalar_lea.hbm %s1757_s0, 32  ;;  %s1415_s29 = int_to_ptr.hbm [resolvable:$true] %s1414_s29 }
  0x20   : > { %s1416_s1 = scalar_lea.hbm %s1415_s29, 16  ;;  %p1418_p10 = pneg %p1643_p2 }
  0x21   : > { %p1417_p9 = scmp.ne.s32.totalorder %s1415_s29, %s1416_s1  ;;  %p1422_p0 = scmp.lt.s32.totalorder %s1415_s29, %s1757_s0 }
  0x22   : > { %p1423_p5 = scmp.lt.s32.totalorder %s1421_s15, %s1416_s1 }
  0x23   : > { %p1419_p12 = pnand %p1418_p10, %p1417_p9 }
  0x24   : > { %p1424_p7 = por %p1423_p5, %p1422_p0 }
  0x25   : > { %p1420_p13 = pneg %p1419_p12 }
  0x27   : > { %p1425_p11 = pnand %p1424_p7, %p1420_p13 }
  0x29   : > { %1428 = shalt.err (!%p1425_p11)
}
  0x2a   : > { %s1520_s11 = smov 128   ;;  %s1521_s18 = smov 8  }
  0x2b   : > { %1299 = dma.hbm_to_vmem [thread:$0]  (!%p1643_p2), %s271_s20, 256, %s273_s19, %s261_s23, %s1520_s11, %s1520_s11, %s1521_s18  }
  0x2c   : > { %284 = sbr.rel (%p1607_p8) target bundleno = 400 (0x190), region = 48  ;;  %s1660_s14 = sand.u32 (!%p1607_p8), 1, %s1506_s25  }
  0x2d   : > { %s1026_s29 = sshll.u32 (!%p1607_p8), %s1660_s14, 4  ;;  %s287_s1 = scalar_lea.sflag (!%p1607_p8), [#allocation3], %s1660_s14 }
  0x2e   : > { %s1666_s13 = scalar_lea.vmem (!%p1607_p8), [#allocation2], %s1026_s29 }
  0x31   : > { %1489 = dma.done.wait (%p1594_p4), %s287_s1, 256  }
  0x32   : > { %1491 = vsyncadd (%p1594_p4), %s287_s1, 4294967040 }
  0x33   : > { %1493 = dma.done.wait (%p45_p1), [#allocation6], 6144  }
  0x34   : > { %1495 = vsyncadd (%p45_p1), [#allocation6], 4294961152  ;;  %v1235_v0 = vld [vmem:[#allocation5 + $0x38] sm:$0xff]  ;;  %v1234_v3 = vld [vmem:[#allocation5 + $0x30] sm:$0xff]  ;;  %v335_v51 = vlaneseq  ;;  %s1276_s17 = sshll.u32 %s1585_s28, 4  ;;  %s910_s28 = scalar_lea.sflag [#allocation4], %s1660_s14 }
  0x35   : > { %v1251_v1 = vld [vmem:[#allocation5 + $0xb8] sm:$0xff]  ;;  %430 = vmatpush.bf16.msra.mxu0 %v1235_v0  ;;  %v1250_v4 = vld [vmem:[#allocation5 + $0xb0] sm:$0xff]  ;;  %v1233_v6 = vld [vmem:[#allocation5 + $0x28] sm:$0xff]  ;;  %s921_s1 = scalar_lea.hbm %s1764_s7, %s1276_s17  ;;  %s1464_s23 = scalar_lea.hbm %s1764_s7, 32 }
  0x36   : > { %v1243_v2 = vld [vmem:[#allocation5 + $0x78] sm:$0xff]  ;;  %526 = vmatpush.bf16.msra.mxu1 %v1251_v1  ;;  %v1242_v5 = vld [vmem:[#allocation5 + $0x70] sm:$0xff]  ;;  %v1249_v7 = vld [vmem:[#allocation5 + $0xa8] sm:$0xff]  ;;  %v336_v54 = vshrl.u32 %v335_v51, 7  ;;  %s924_s12 = sshll.u32 %s921_s1, 4  ;;  %s925_s12 = int_to_ptr.hbm [resolvable:$true] %s924_s12 }
  0x37   : > { %595 = vmatpush.bf16.msra.mxu2 %v1243_v2  ;;  %v1241_v8 = vld [vmem:[#allocation5 + $0x68] sm:$0xff]  ;;  %v1259_v9 = vld [vmem:[#allocation7 + $0x38] sm:$0xff]  ;;  %v1232_v10 = vld [vmem:[#allocation5 + $0x20] sm:$0xff]  ;;  %s1458_s19 = sshra.s32 %s925_s12, 4  ;;  %s1459_s19 = int_to_ptr.hbm [resolvable:$true] %s1458_s19 }
  0x38   : > { %v1248_v11 = vld [vmem:[#allocation5 + $0xa0] sm:$0xff]  ;;  %701 = vmatpush.bf16.msra.mxu3 %v1259_v9  ;;  %v1231_v13 = vld [vmem:[#allocation5 + $0x18] sm:$0xff]  ;;  %v1230_v16 = vld [vmem:[#allocation5 + $0x10] sm:$0xff]  ;;  %v342_v55 = vand.u32 15, %v336_v54  ;;  %v337_v56 = vadd.s32 8, %v336_v54  ;;  %vm542_vm0 = vcmp.lt.s32.totalorder %v336_v54, 1  ;;  %p1465_p11 = scmp.lt.s32.totalorder %s1459_s19, %s1764_s7 }
  0x39   : > { %431 = vmatpush.bf16.msra.mxu0 %v1234_v3  ;;  %v1240_v12 = vld [vmem:[#allocation5 + $0x60] sm:$0xff]  ;;  %v1247_v14 = vld [vmem:[#allocation5 + $0x98] sm:$0xff]  ;;  %v1246_v17 = vld [vmem:[#allocation5 + $0x90] sm:$0xff]  ;;  %vm611_vm2 = vcmp.lt.s32.totalorder %v336_v54, 7  ;;  %s1460_s20 = scalar_lea.hbm %s1459_s19, 16 }
  0x3a   : > { %527 = vmatpush.bf16.msra.mxu1 %v1250_v4  ;;  %v1239_v15 = vld [vmem:[#allocation5 + $0x58] sm:$0xff]  ;;  %v1238_v18 = vld [vmem:[#allocation5 + $0x50] sm:$0xff]  ;;  %v1229_v19 = vld [vmem:[#allocation5 + $0x8] sm:$0xff]  ;;  %vm1684_vm1 = vcmp.ne.s32.totalorder %v342_v55, 0  ;;  %v349_v0 = vand.u32 15, %v337_v56  ;;  %p1461_p1 = scmp.ne.s32.totalorder %s1459_s19, %s1460_s20  ;;  %p1466_p2 = scmp.lt.s32.totalorder %s1464_s23, %s1460_s20 }
  0x3b   : > { %596 = vmatpush.bf16.msra.mxu2 %v1242_v5  ;;  %v1245_v20 = vld [vmem:[#allocation5 + $0x88] sm:$0xff]  ;;  %v1228_v22 = vld [vmem:[#allocation5] sm:$0xff]  ;;  %v1275_v27 = vld [vmem:[#allocation7 + $0xb8] sm:$0xff] }
  0x3c   : > { %v1237_v21 = vld [vmem:[#allocation5 + $0x48] sm:$0xff]  ;;  %v1244_v23 = vld [vmem:[#allocation5 + $0x80] sm:$0xff]  ;;  %v1267_v28 = vld [vmem:[#allocation7 + $0x78] sm:$0xff]  ;;  %vm1695_vm3 = vcmp.ne.s32.totalorder %v349_v0, 15  ;;  %p1462_p4 = pnand %p1461_p1, %p1630_p3  ;;  %p1467_p9 = por %p1466_p2, %p1465_p11 }
  0x3d   : > { %432 = vmatpush.bf16.msra.mxu0 %v1233_v6  ;;  %v1677_v24 = vld [vmem:[%s1666_s13] sm:$0xff]  ;;  %v1680_v25 = vld [vmem:[%s1666_s13 + $0x8] sm:$0xff]  ;;  %s331_s13 = scalar_lea.vmem [#allocation8], %s1026_s29 }
  0x3e   : > { %528 = vmatpush.bf16.msra.mxu1 %v1249_v7  ;;  %v1236_v26 = vld [vmem:[#allocation5 + $0x40] sm:$0xff]  ;;  %v334_v29 = vpack.c.bf16 %v1680_v25, %v1677_v24  ;;  %v1258_v30 = vld [vmem:[#allocation7 + $0x30] sm:$0xff]  ;;  %v1257_v33 = vld [vmem:[#allocation7 + $0x28] sm:$0xff]  ;;  %s922_s30 = sshll.u32 %s331_s13, 4  ;;  %p1463_p8 = pneg %p1462_p4  ;;  %s923_s30 = int_to_ptr.vmem [resolvable:$true] %s922_s30 }
  0x3f   : > { %597 = vmatpush.bf16.msra.mxu2 %v1241_v8  ;;  %v1274_v31 = vld [vmem:[#allocation7 + $0xb0] sm:$0xff]  ;;  %702 = vmatpush.bf16.msra.mxu3 %v1258_v30  ;;  %v1273_v34 = vld [vmem:[#allocation7 + $0xa8] sm:$0xff]  ;;  %v1256_v36 = vld [vmem:[#allocation7 + $0x20] sm:$0xff] }
  0x40   : > { %v1266_v32 = vld [vmem:[#allocation7 + $0x70] sm:$0xff]  ;;  %v1265_v35 = vld [vmem:[#allocation7 + $0x68] sm:$0xff]  ;;  %v1272_v37 = vld [vmem:[#allocation7 + $0xa0] sm:$0xff]  ;;  %p1468_p10 = pnand %p1467_p9, %p1463_p8 }
  0x41   : > { %433 = vmatpush.bf16.msra.mxu0 %v1232_v10  ;;  %v1264_v38 = vld [vmem:[#allocation7 + $0x60] sm:$0xff]  ;;  %v1255_v39 = vld [vmem:[#allocation7 + $0x18] sm:$0xff]  ;;  %v1254_v42 = vld [vmem:[#allocation7 + $0x10] sm:$0xff] }
  0x42   : > { %529 = vmatpush.bf16.msra.mxu1 %v1248_v11  ;;  %v1271_v40 = vld [vmem:[#allocation7 + $0x98] sm:$0xff]  ;;  %v1270_v43 = vld [vmem:[#allocation7 + $0x90] sm:$0xff]  ;;  %v1253_v45 = vld [vmem:[#allocation7 + $0x8] sm:$0xff] }
  0x43   : > { %598 = vmatpush.bf16.msra.mxu2 %v1240_v12  ;;  %703 = vmatpush.bf16.msra.mxu3 %v1257_v33  ;;  %v1263_v41 = vld [vmem:[#allocation7 + $0x58] sm:$0xff]  ;;  %v1262_v44 = vld [vmem:[#allocation7 + $0x50] sm:$0xff]  ;;  %v1269_v46 = vld [vmem:[#allocation7 + $0x88] sm:$0xff] }
  0x44   : > { %v1261_v47 = vld [vmem:[#allocation7 + $0x48] sm:$0xff]  ;;  %v1252_v48 = vld [vmem:[#allocation7] sm:$0xff] }
  0x45   : > { %434 = vmatpush.bf16.msra.mxu0 %v1231_v13  ;;  %v1268_v49 = vld [vmem:[#allocation7 + $0x80] sm:$0xff] }
  0x46   : > { %530 = vmatpush.bf16.msra.mxu1 %v1247_v14  ;;  %v1260_v50 = vld [vmem:[#allocation7 + $0x40] sm:$0xff] }
  0x47   : > { %599 = vmatpush.bf16.msra.mxu2 %v1239_v15  ;;  %704 = vmatpush.bf16.msra.mxu3 %v1256_v36  ;;  %v1350_v5 = vld [vmem:[%s1760_s3] ss:$0 sm:$0xff] }
  0x48   : > { %v1351_v12 = vld [vmem:[%s1761_s4] ss:$0 sm:$0xff] }
  0x49   : > { %435 = vmatpush.bf16.msra.mxu0 %v1230_v16 }
  0x4a   : > { %531 = vmatpush.bf16.msra.mxu1 %v1246_v17 }
  0x4b   : > { %600 = vmatpush.bf16.msra.mxu2 %v1238_v18  ;;  %705 = vmatpush.bf16.msra.mxu3 %v1255_v39 }
  0x4d   : > { %436 = vmatpush.bf16.msra.mxu0 %v1229_v19 }
  0x4e   : > { %532 = vmatpush.bf16.msra.mxu1 %v1245_v20 }
  0x4f   : > { %601 = vmatpush.bf16.msra.mxu2 %v1237_v21  ;;  %706 = vmatpush.bf16.msra.mxu3 %v1254_v42  ;;  %v1352_v42 = vld [vmem:[%s1762_s5] ss:$0 sm:$0xff] }
  0x51   : > { %437 = vmatpush.bf16.msra.mxu0 %v1228_v22 }
  0x52   : > { %533 = vmatpush.bf16.msra.mxu1 %v1244_v23 }
  0x53   : > { %602 = vmatpush.bf16.msra.mxu2 %v1236_v26  ;;  %707 = vmatpush.bf16.msra.mxu3 %v1253_v45 }
  0x54   : > { %438 = vmatmul.bf16.vlgmr.msra.gmra.mxu0 %v334_v29 }
  0x55   : > { %797 = vmatpush.bf16.msrb.mxu0 %v1275_v27  ;;  %534 = vmatmul.bf16.vlgmr.msra.gmra.mxu1 %v334_v29 }
  0x56   : > { %865 = vmatpush.bf16.msrb.mxu1 %v1267_v28  ;;  %603 = vmatmul.bf16.vlgmr.msra.gmra.mxu2 %v334_v29 }
  0x57   : > { %708 = vmatpush.bf16.msra.mxu3 %v1252_v48 }
  0x59   : > { %798 = vmatpush.bf16.msrb.mxu0 %v1274_v31 }
  0x5a   : > { %866 = vmatpush.bf16.msrb.mxu1 %v1266_v32 }
  0x5d   : > { %799 = vmatpush.bf16.msrb.mxu0 %v1273_v34 }
  0x5e   : > { %867 = vmatpush.bf16.msrb.mxu1 %v1265_v35 }
  0x61   : > { %800 = vmatpush.bf16.msrb.mxu0 %v1272_v37 }
  0x62   : > { %868 = vmatpush.bf16.msrb.mxu1 %v1264_v38 }
  0x65   : > { %801 = vmatpush.bf16.msrb.mxu0 %v1271_v40 }
  0x66   : > { %869 = vmatpush.bf16.msrb.mxu1 %v1263_v41 }
  0x69   : > { %802 = vmatpush.bf16.msrb.mxu0 %v1270_v43 }
  0x6a   : > { %870 = vmatpush.bf16.msrb.mxu1 %v1262_v44 }
  0x6d   : > { %803 = vmatpush.bf16.msrb.mxu0 %v1269_v46 }
  0x6e   : > { %871 = vmatpush.bf16.msrb.mxu1 %v1261_v47  ;;  %v1353_v47 = vld [vmem:[%s1763_s6] ss:$0 sm:$0xff] }
  0x71   : > { %804 = vmatpush.bf16.msrb.mxu0 %v1268_v49 }
  0x72   : > { %872 = vmatpush.bf16.msrb.mxu1 %v1260_v50 }
  0xd1   : > { %v439_v52 = vpop.f32.mrf.mxu0 }
  0xd2   : > { %v535_v53 = vpop.f32.mrf.mxu1  ;;  %v540_v60 = vrot.slane %v439_v52, 7 }
  0xd3   : > { %v609_v2 = vrot.slane %v535_v53, 1 }
  0xd9   : > { %v604_v57 = vpop.f32.mrf.mxu2  ;;  %v441_v58 = vpop.f32.mrf.mxu0 }
  0xda   : > { %v537_v59 = vpop.f32.mrf.mxu1  ;;  %v541_v62 = vrot.slane %v441_v58, 7 }
  0xdb   : > { %v610_v63 = vrot.slane %v537_v59, 1 }
  0xdc   : > { %v544_v1 = vsel %vm542_vm0, %v541_v62, %v540_v60  ;;  %v543_v10 = vsel %vm542_vm0, %v540_v60, %v541_v62 }
  0xdd   : > { %v545_v3 = vsel %vm1684_vm1, %v544_v1, 0.0  ;;  %v612_v6 = vsel %vm611_vm2, %v609_v2, %v610_v63  ;;  %v613_v8 = vsel %vm611_vm2, %v610_v63, %v609_v2 }
  0xde   : > { %v605_v4 = vadd.f32 %v604_v57, %v545_v3  ;;  %v615_v14 = vsel %vm1695_vm3, %v613_v8, 0.0 }
  0xe0   : > { %v616_v9 = vadd.f32 %v612_v6, %v605_v4 }
  0xe1   : > { %v606_v11 = vpop.f32.mrf.mxu2 }
  0xe2   : > { %v607_v13 = vadd.f32 %v606_v11, %v543_v10  ;;  %v622_v15 = vmul.f32 %v1350_v5, %v616_v9 }
  0xe4   : > { %v617_v16 = vadd.f32 %v615_v14, %v607_v13  ;;  %v628_v17 = vadd.f32 %v1351_v12, %v622_v15 }
  0xe6   : > { %v623_v18 = vmul.f32 %v1350_v5, %v617_v16  ;;  %v632_v20 = vmul.f32 0.01, %v628_v17  ;;  %vm630_vm4 = vcmp.gt.f32.partialorder %v628_v17, 0.0 }
  0xe8   : > { %v629_v19 = vadd.f32 %v1351_v12, %v623_v18  ;;  %v634_v22 = vsel %vm630_vm4, %v628_v17, %v632_v20 }
  0xea   : > { %vm631_vm5 = vcmp.gt.f32.partialorder %v629_v19, 0.0  ;;  %v633_v21 = vmul.f32 0.01, %v629_v19 }
  0xec   : > { %v635_v23 = vsel %vm631_vm5, %v629_v19, %v633_v21 }
  0xed   : > { %v636_v26 = vpack.c.bf16 %v635_v23, %v634_v22 }
  0xef   : > { %709 = vmatmul.bf16.vlgmr.msra.gmra.mxu3 %v636_v26  ;;  %805 = vmatmul.bf16.vlgmr.msrb.gmra.mxu0 %v636_v26 }
  0xf0   : > { %873 = vmatmul.bf16.vlgmr.msrb.gmra.mxu1 %v636_v26 }
 0x16c   : > { %v806_v27 = vpop.f32.mrf.mxu0 }
 0x16d   : > { %v874_v29 = vpop.f32.mrf.mxu1  ;;  %v879_v32 = vrot.slane %v806_v27, 1 }
 0x172   : > { %v710_v28 = vpop.f32.mrf.mxu3 }
 0x173   : > { %v811_v34 = vrot.slane %v710_v28, 7 }
 0x174   : > { %v808_v30 = vpop.f32.mrf.mxu0 }
 0x175   : > { %v880_v31 = vrot.slane %v808_v30, 1  ;;  %v876_v37 = vpop.f32.mrf.mxu1 }
 0x177   : > { %v882_v36 = vsel %vm611_vm2, %v880_v31, %v879_v32  ;;  %v881_v45 = vsel %vm611_vm2, %v879_v32, %v880_v31 }
 0x178   : > { %v884_v43 = vsel %vm1695_vm3, %v882_v36, 0.0 }
 0x17a   : > { %v712_v33 = vpop.f32.mrf.mxu3 }
 0x17b   : > { %v812_v35 = vrot.slane %v712_v33, 7 }
 0x17d   : > { %v813_v38 = vsel %vm542_vm0, %v811_v34, %v812_v35  ;;  %v814_v39 = vsel %vm542_vm0, %v812_v35, %v811_v34 }
 0x17e   : > { %v815_v40 = vsel %vm1684_vm1, %v814_v39, 0.0  ;;  %v877_v41 = vadd.f32 %v876_v37, %v813_v38 }
 0x17f   : > { %v875_v44 = vadd.f32 %v874_v29, %v815_v40 }
 0x180   : > { %v886_v46 = vadd.f32 %v884_v43, %v877_v41 }
 0x181   : > { %v885_v48 = vadd.f32 %v881_v45, %v875_v44 }
 0x182   : > { %v892_v49 = vmul.f32 %v1352_v42, %v886_v46 }
 0x183   : > { %v891_v50 = vmul.f32 %v1352_v42, %v885_v48 }
 0x184   : > { %v898_v51 = vadd.f32 %v1353_v47, %v892_v49 }
 0x185   : > { %v897_v52 = vadd.f32 %v1353_v47, %v891_v50 }
 0x186   : > { %v900_v53 = vadd.f32 %v898_v51, %v1680_v25 }
 0x187   : > { %v899_v54 = vadd.f32 %v897_v52, %v1677_v24 }
 0x188   : > { %vm902_vm6 = vcmp.gt.f32.partialorder %v900_v53, 0.0  ;;  %v904_v55 = vmul.f32 0.01, %v900_v53 }
 0x189   : > { %vm901_vm7 = vcmp.gt.f32.partialorder %v899_v54, 0.0  ;;  %v903_v56 = vmul.f32 0.01, %v899_v54 }
 0x18a   : > { %v906_v57 = vsel %vm902_vm6, %v900_v53, %v904_v55 }
 0x18b   : > { %v905_v58 = vsel %vm901_vm7, %v899_v54, %v903_v56  ;;  %908 = vst [vmem:[%s331_s13 + $0x8] sm:$0xff] %v906_v57 }
 0x18c   : > { %907 = vst [vmem:[%s331_s13] sm:$0xff] %v905_v58 }
 0x18d   : > { %1471 = shalt.err (!%p1468_p10)
}
 0x18e   : > { %s1522_s14 = smov 128   ;;  %s1523_s17 = smov 8  }
 0x18f   : > { %1287 = dma.vmem_to_hbm [thread:$0]  (%p1630_p3), %s923_s30, 256, %s925_s12, %s910_s28, %s1522_s14, %s1522_s14, %s1523_s17  }
 0x190 PF: > { %s939_s11 = sand.u32 1, %s1502_s24   ;;  %p1776_p12 = scmp.ge.s32.totalorder %s1514_s27, 2 }
 0x191   : > { %s940_s18 = scalar_lea.sflag [#allocation4], %s939_s11 }
 0x192   : > { %p1301_p13 = pnand %p1776_p12, %p1599_p6 }
 0x194   : > { %p1302_p0 = pneg %p1301_p13 }
 0x196   : > { %1497 = dma.done.wait (%p1302_p0), %s940_s18, 256  }
 0x197   : > { %1499 = vsyncadd (%p1302_p0), %s940_s18, 4294967040  ;;  %p21_p5 = scmp.ge.s32.totalorder %s1620_s22, 4   ;;  %s1777_s24 = smov %s1506_s25 }
 0x198   : > { %s1778_s25 = smov %s1510_s26  ;;  %s1779_s26 = smov %s1636_s10 }
 0x199   : > { %s1780_s27 = smov %s1620_s22  ;;  %23 = sbr.rel (!%p21_p5) target bundleno = 8 (0x8), region = 105 }
 0x19e   :  { %946 = vsyncpa [#allocation3], 1 }
 0x19f   :  { %948 = vsyncpa [#allocation3 + $0x1], 1 }
 0x1a0   :  { %949 = vsyncpa [#allocation6], 1 }
 0x1a1   :  { %950 = vsyncpa [#allocation4], 1 }
 0x1a2   :  { %952 = vsyncpa [#allocation4 + $0x1], 1 }

</bundles_post_ra>
